<compile_context>
chip_gen: v7x
topology: tpu7x:2x2x1
jax: 0.10.0
libtpu: 0.0.40
codegen_flags: <defaults>
</compile_context>

<pallas_src>
import functools

import jax
import jax.numpy as jnp
from jax.experimental import pallas as pl
from jax.experimental.pallas import tpu as pltpu

# ----- model hyper-parameters (static, matching the PyTorch module) -----
D_IN = 16
H = 32
D_OUT = 4
NO_HIDD_LAYERS = 2                  # number of (H,H) hidden linears
N_LAYERS = NO_HIDD_LAYERS + 2       # first + hidden + output linears

# ----- TPU layout constants -----
LANES = 128                         # lane width: internal feature dim padded to this
F_PAD = LANES                       # padded feature dim (>= max(D_IN, H, D_OUT))
BIAS_ROW = F_PAD                    # row inside the slab holding the folded bias
SLAB_ROWS = F_PAD + 8               # keep the sublane dim a multiple of 8


def _round_up(n, m):
    return ((n + m - 1) // m) * m


def _choose_tiling(B, block_b):
    """Balanced batch tiles, >= 2 tiles so both v7x TensorCores get work."""
    n_tiles = max(2, -(-B // block_b))
    tb = _round_up(-(-B // n_tiles), 8)       # sublane-aligned tile
    bp = tb * n_tiles                         # padded batch (>= B, minimal waste)
    return tb, bp, n_tiles


def _make_mlp_kernel(n_layers, compute_dtype):
    """Kernel body with the layer loop statically unrolled.

    Invariant from pack_params: all padded rows/lanes of the slab are exactly zero,
    so padded activation lanes stay exactly 0 through bias-add and tanh.
    """
    cd = compute_dtype

    def mlp_kernel(x_ref, w_ref, o_ref):
        # --- layer 0: (tb, D_IN) @ (D_IN, F_PAD) ---
        h = x_ref[...].astype(cd)
        w = w_ref[0, :D_IN, :].astype(cd)
        b = w_ref[0, BIAS_ROW:BIAS_ROW + 1, :]                 # f32 folded bias row
        y = jnp.dot(h, w, preferred_element_type=jnp.float32) + b
        h = jnp.tanh(y)                                        # f32, padded lanes == 0

        # --- hidden layers: (tb, F_PAD) @ (F_PAD, F_PAD) ---
        for i in range(1, n_layers - 1):
            w = w_ref[i, :F_PAD, :].astype(cd)
            b = w_ref[i, BIAS_ROW:BIAS_ROW + 1, :]
            y = jnp.dot(h.astype(cd), w, preferred_element_type=jnp.float32) + b
            h = jnp.tanh(y)

        # --- output layer: no activation, only the first D_OUT lanes are real ---
        w = w_ref[n_layers - 1, :F_PAD, :].astype(cd)
        b = w_ref[n_layers - 1, BIAS_ROW:BIAS_ROW + 1, :]
        y = jnp.dot(h.astype(cd), w, preferred_element_type=jnp.float32) + b
        o_ref[...] = y[:, :D_OUT].astype(o_ref.dtype)

    return mlp_kernel


def pack_params(params):
    """Pack all weights + biases into a single zero-padded f32 slab.

    slab[i, :in_i, :out_i]    = W_i  (stored (in, out) == torch weight (out,in).T)
    slab[i, BIAS_ROW, :out_i] = b_i
    Everything else is zero: padded lanes contribute exactly 0 through the padded
    matmuls and tanh, so the padded math reproduces the unpadded math in f32.
    """
    w0, b0, wh, bh, wo, bo = params
    slab = jnp.zeros((N_LAYERS, SLAB_ROWS, F_PAD), jnp.float32)
    slab = slab.at[0, :D_IN, :H].set(w0)
    slab = slab.at[0, BIAS_ROW, :H].set(b0.reshape(-1))
    for i in range(NO_HIDD_LAYERS):
        slab = slab.at[1 + i, :H, :H].set(wh[i])
        slab = slab.at[1 + i, BIAS_ROW, :H].set(bh[i].reshape(-1))
    slab = slab.at[N_LAYERS - 1, :H, :D_OUT].set(wo)
    slab = slab.at[N_LAYERS - 1, BIAS_ROW, :D_OUT].set(bo.reshape(-1))
    return slab


@functools.partial(jax.jit, static_argnames=("compute_dtype", "block_b"))
def customizable_net_forward(x, slab, *, compute_dtype=jnp.bfloat16, block_b=1024):
    """Full MLP forward in one pallas_call.

    x:    (B, D_IN) float32
    slab: (N_LAYERS, SLAB_ROWS, F_PAD) packed f32 weights+biases (see pack_params)
    compute_dtype: matmul-operand dtype. bf16 (default) = native MXU fast path;
                   f32 = bit-exact PyTorch semantics. Accumulate/bias/tanh are f32
                   in both modes; bias rows never leave f32.
    """
    B = x.shape[0]
    tb, bp, n_tiles = _choose_tiling(B, block_b)

    # Only pad batch rows when needed (zero rows, discarded on output).
    xp = x if bp == B else jnp.zeros((bp, D_IN), x.dtype).at[:B].set(x)

    # Cost of the padded work actually issued by the kernel.
    cost = pl.CostEstimate(
        flops=2 * bp * F_PAD * (D_IN + (NO_HIDD_LAYERS + 1) * F_PAD),
        transcendentals=bp * F_PAD * (NO_HIDD_LAYERS + 1),
        bytes_accessed=(bp * D_IN * x.dtype.itemsize
                        + slab.size * slab.dtype.itemsize
                        + bp * D_OUT * 4),
    )

    out = pl.pallas_call(
        _make_mlp_kernel(N_LAYERS, compute_dtype),
        out_shape=jax.ShapeDtypeStruct((bp, D_OUT), jnp.float32),
        grid_spec=pltpu.PrefetchScalarGridSpec(
            num_scalar_prefetch=0,
            grid=(n_tiles,),
            in_specs=[
                # batch-tiled activations: last dim D_IN == full array dim (legal)
                pl.BlockSpec((tb, D_IN), lambda i: (i, 0)),
                # packed f32 weight slab; constant block index -> fetched once per core
                pl.BlockSpec((N_LAYERS, SLAB_ROWS, F_PAD), lambda i: (0, 0, 0)),
            ],
            # narrow (tb, D_OUT) output: only real lanes hit HBM
            out_specs=pl.BlockSpec((tb, D_OUT), lambda i: (i, 0)),
        ),
        compiler_params=pltpu.CompilerParams(
            dimension_semantics=("parallel",),   # lets v7x's 2 TCs split the batch
        ),
        cost_estimate=cost,
    )(xp, slab)

    return out[:B]


def init_params(key):
    """Deterministic synthetic parameters (shapes match the PyTorch module)."""
    ks = jax.random.split(key, 6)
    scale0 = 1.0 / jnp.sqrt(D_IN)
    scaleh = 1.0 / jnp.sqrt(H)
    # weights stored as (in, out) = torch weight (out, in) transposed
    w0 = jax.random.uniform(ks[0], (D_IN, H), jnp.float32, -scale0, scale0)
    b0 = jax.random.uniform(ks[1], (1, H), jnp.float32, -scale0, scale0)
    wh = jax.random.uniform(ks[2], (NO_HIDD_LAYERS, H, H), jnp.float32, -scaleh, scaleh)
    bh = jax.random.uniform(ks[3], (NO_HIDD_LAYERS, 1, H), jnp.float32, -scaleh, scaleh)
    wo = jax.random.uniform(ks[4], (H, D_OUT), jnp.float32, -scaleh, scaleh)
    bo = jax.random.uniform(ks[5], (1, D_OUT), jnp.float32, -scaleh, scaleh)
    return w0, b0, wh, bh, wo, bo


def reference_forward(x, params):
    """Pure-JAX reference of the same forward pass (for correctness checks)."""
    w0, b0, wh, bh, wo, bo = params
    h = jnp.tanh(x @ w0 + b0)
    for i in range(NO_HIDD_LAYERS):
        h = jnp.tanh(h @ wh[i] + bh[i])
    return h @ wo + bo


if __name__ == "__main__":
    key = jax.random.PRNGKey(0)
    k_x, k_p, k_x2 = jax.random.split(key, 3)

    params = init_params(k_p)
    slab = pack_params(params)

    # Small batch, f32 operands: exact semantics of the PyTorch module.
    x = jax.random.normal(k_x, (8, D_IN), jnp.float32)
    out = jax.block_until_ready(
        customizable_net_forward(x, slab, compute_dtype=jnp.float32))
    ref = reference_forward(x, params)
    assert out.shape == (8, D_OUT)
    assert jnp.allclose(out, ref, atol=1e-5, rtol=1e-5)

    # Default bf16 matmul-operand fast path (f32 accumulate/bias/tanh).
    out_bf16 = jax.block_until_ready(customizable_net_forward(x, slab))
    assert out_bf16.shape == (8, D_OUT)
    assert jnp.allclose(out_bf16, ref, atol=1e-1, rtol=1e-1)

    # Larger batch exercising the balanced parallel batch grid (272 -> 2 tiles of 136).
    x2 = jax.random.normal(k_x2, (272, D_IN), jnp.float32)
    out2 = jax.block_until_ready(
        customizable_net_forward(x2, slab, compute_dtype=jnp.float32))
    ref2 = reference_forward(x2, params)
    assert out2.shape == (272, D_OUT)
    assert jnp.allclose(out2, ref2, atol=1e-4, rtol=1e-4)

    out2_bf16 = jax.block_until_ready(customizable_net_forward(x2, slab))
    assert jnp.allclose(out2_bf16, ref2, atol=1e-1, rtol=1e-1)

    print("KERNEL_OK")
</pallas_src>

<mosaic_0001>
module attributes {stable_mosaic.version = 11 : i64} {
  func.func @mlp_kernel(%arg0: i32, %arg1: memref<8x16xf32, #tpu.memory_space<vmem>>, %arg2: memref<4x136x128xf32, #tpu.memory_space<vmem>>, %arg3: memref<8x4xf32, #tpu.memory_space<vmem>>) attributes {dimension_semantics = [#tpu.dimension_semantics<parallel>], iteration_bounds = array<i64: 2>, scalar_prefetch = 0 : i64, scratch_operands = 0 : i64, tpu.core_type = #tpu.core_type<tc>, window_params = [{transform_indices = @transform_0, window_bounds = array<i64: 8, 16>}, {pipeline_mode = #tpu.pipeline_mode<synchronous>, transform_indices = @transform_1, window_bounds = array<i64: 4, 136, 128>}, {transform_indices = @transform_2, window_bounds = array<i64: 8, 4>}]} {
    %c0 = arith.constant 0 : index
    %c0_0 = arith.constant 0 : index
    %0 = vector.load %arg1[%c0, %c0_0] : memref<8x16xf32, #tpu.memory_space<vmem>>, vector<8x16xf32>
    %c0_1 = arith.constant 0 : index
    %c0_2 = arith.constant 0 : index
    %c0_3 = arith.constant 0 : index
    %1 = vector.load %arg2[%c0_1, %c0_2, %c0_3] : memref<4x136x128xf32, #tpu.memory_space<vmem>>, vector<1x16x128xf32>
    %2 = vector.shape_cast %1 : vector<1x16x128xf32> to vector<16x128xf32>
    %c0_4 = arith.constant 0 : index
    %c128 = arith.constant 128 : index
    %c0_5 = arith.constant 0 : index
    %3 = vector.load %arg2[%c0_4, %c128, %c0_5] : memref<4x136x128xf32, #tpu.memory_space<vmem>>, vector<1x1x128xf32>
    %4 = vector.shape_cast %3 : vector<1x1x128xf32> to vector<1x128xf32>
    %cst = arith.constant dense<0.000000e+00> : vector<8x128xf32>
    %5 = tpu.matmul %0, %2, %cst {dimension_numbers = #tpu.dot_dimension_numbers<[1], [0], [0], [1], [0, 0, 1, 1], [], []>} : vector<8x16xf32>, vector<16x128xf32>, vector<8x128xf32> -> vector<8x128xf32>
    %6 = vector.broadcast %4 : vector<1x128xf32> to vector<8x128xf32>
    %7 = arith.addf %5, %6 : vector<8x128xf32>
    %8 = math.tanh %7 : vector<8x128xf32>
    %c1 = arith.constant 1 : index
    %c0_6 = arith.constant 0 : index
    %c0_7 = arith.constant 0 : index
    %9 = vector.load %arg2[%c1, %c0_6, %c0_7] : memref<4x136x128xf32, #tpu.memory_space<vmem>>, vector<1x128x128xf32>
    %10 = vector.shape_cast %9 : vector<1x128x128xf32> to vector<128x128xf32>
    %c1_8 = arith.constant 1 : index
    %c128_9 = arith.constant 128 : index
    %c0_10 = arith.constant 0 : index
    %11 = vector.load %arg2[%c1_8, %c128_9, %c0_10] : memref<4x136x128xf32, #tpu.memory_space<vmem>>, vector<1x1x128xf32>
    %12 = vector.shape_cast %11 : vector<1x1x128xf32> to vector<1x128xf32>
    %cst_11 = arith.constant dense<0.000000e+00> : vector<8x128xf32>
    %13 = tpu.matmul %8, %10, %cst_11 {dimension_numbers = #tpu.dot_dimension_numbers<[1], [0], [0], [1], [0, 0, 1, 1], [], []>} : vector<8x128xf32>, vector<128x128xf32>, vector<8x128xf32> -> vector<8x128xf32>
    %14 = vector.broadcast %12 : vector<1x128xf32> to vector<8x128xf32>
    %15 = arith.addf %13, %14 : vector<8x128xf32>
    %16 = math.tanh %15 : vector<8x128xf32>
    %c2 = arith.constant 2 : index
    %c0_12 = arith.constant 0 : index
    %c0_13 = arith.constant 0 : index
    %17 = vector.load %arg2[%c2, %c0_12, %c0_13] : memref<4x136x128xf32, #tpu.memory_space<vmem>>, vector<1x128x128xf32>
    %18 = vector.shape_cast %17 : vector<1x128x128xf32> to vector<128x128xf32>
    %c2_14 = arith.constant 2 : index
    %c128_15 = arith.constant 128 : index
    %c0_16 = arith.constant 0 : index
    %19 = vector.load %arg2[%c2_14, %c128_15, %c0_16] : memref<4x136x128xf32, #tpu.memory_space<vmem>>, vector<1x1x128xf32>
    %20 = vector.shape_cast %19 : vector<1x1x128xf32> to vector<1x128xf32>
    %cst_17 = arith.constant dense<0.000000e+00> : vector<8x128xf32>
    %21 = tpu.matmul %16, %18, %cst_17 {dimension_numbers = #tpu.dot_dimension_numbers<[1], [0], [0], [1], [0, 0, 1, 1], [], []>} : vector<8x128xf32>, vector<128x128xf32>, vector<8x128xf32> -> vector<8x128xf32>
    %22 = vector.broadcast %20 : vector<1x128xf32> to vector<8x128xf32>
    %23 = arith.addf %21, %22 : vector<8x128xf32>
    %24 = math.tanh %23 : vector<8x128xf32>
    %c3 = arith.constant 3 : index
    %c0_18 = arith.constant 0 : index
    %c0_19 = arith.constant 0 : index
    %25 = vector.load %arg2[%c3, %c0_18, %c0_19] : memref<4x136x128xf32, #tpu.memory_space<vmem>>, vector<1x128x128xf32>
    %26 = vector.shape_cast %25 : vector<1x128x128xf32> to vector<128x128xf32>
    %c3_20 = arith.constant 3 : index
    %c128_21 = arith.constant 128 : index
    %c0_22 = arith.constant 0 : index
    %27 = vector.load %arg2[%c3_20, %c128_21, %c0_22] : memref<4x136x128xf32, #tpu.memory_space<vmem>>, vector<1x1x128xf32>
    %28 = vector.shape_cast %27 : vector<1x1x128xf32> to vector<1x128xf32>
    %cst_23 = arith.constant dense<0.000000e+00> : vector<8x128xf32>
    %29 = tpu.matmul %24, %26, %cst_23 {dimension_numbers = #tpu.dot_dimension_numbers<[1], [0], [0], [1], [0, 0, 1, 1], [], []>} : vector<8x128xf32>, vector<128x128xf32>, vector<8x128xf32> -> vector<8x128xf32>
    %30 = vector.broadcast %28 : vector<1x128xf32> to vector<8x128xf32>
    %31 = arith.addf %29, %30 : vector<8x128xf32>
    %32 = vector.extract_strided_slice %31 {offsets = [0, 0], sizes = [8, 4], strides = [1, 1]} : vector<8x128xf32> to vector<8x4xf32>
    %c0_24 = arith.constant 0 : index
    %c0_25 = arith.constant 0 : index
    %33 = vector.load %arg3[%c0_24, %c0_25] : memref<8x4xf32, #tpu.memory_space<vmem>>, vector<8x4xf32>
    tpu.vector_store %arg3[%c0_24, %c0_25], %32 {strides = array<i32>} : memref<8x4xf32, #tpu.memory_space<vmem>>, vector<8x4xf32>,
    return
  }
  func.func @transform_0(%arg0: i32) -> (i32, i32) {
    %c0_i32 = arith.constant 0 : i32
    %c0_i32_0 = arith.constant 0 : i32
    return %arg0, %c0_i32 : i32, i32
  }
  func.func @transform_1(%arg0: i32) -> (i32, i32, i32) {
    %c0_i32 = arith.constant 0 : i32
    %c0_i32_0 = arith.constant 0 : i32
    %c0_i32_1 = arith.constant 0 : i32
    %c0_i32_2 = arith.constant 0 : i32
    return %c0_i32, %c0_i32_0, %c0_i32_1 : i32, i32, i32
  }
  func.func @transform_2(%arg0: i32) -> (i32, i32) {
    %c0_i32 = arith.constant 0 : i32
    %c0_i32_0 = arith.constant 0 : i32
    return %arg0, %c0_i32 : i32, i32
  }
}

</mosaic_0001>

<bundles_post_ra>
// kernel: customizable_net_forward.1
= control target key start
LH: loop header
LB: loop body
LE: loop exit
PB: predicated region body
PF: predicated region fallthrough
CT: control target
= control target key end

     0   :  { %7 = vsyncpa [#allocation3], 0  ;;  %s930_s9 = smov 0   ;;  %s1026_s0 = inlined_call_operand.vmem [shape: f32[16,16], index: 0, kind: input, shape index: {}]   ;;  %s1027_s1 = inlined_call_operand.hbm [shape: f32[4,136,128], index: 1, kind: input, shape index: {}]   ;;  %s1028_s2 = inlined_call_operand.vmem [shape: f32[16,4], index: 2, kind: output, shape index: {}]  }
   0x1 LB: > { %s936_s10 = sadd.s32 4294967295, %s907_s9   ;;  %p584_p0 = scmp.ge.s32.totalorder %s907_s9, 1  ;;  %s907_s9 = sphi %s930_s9, %s13_s9  }
   0x2   : > { %p91_p1 = scmp.lt.s32.totalorder %s907_s9, 3  ;;  %s909_s11 = smov [#allocation2]  }
   0x3   : > { %s103_s12 = sshll.u32 %s909_s11, 4  ;;  %p1029_p3 = scmp.eq.s32.totalorder %s936_s10, 0  ;;  %s104_s12 = int_to_ptr.vmem [resolvable:$true] %s103_s12 }
   0x4   : > { %p940_p2 = pnand %p584_p0, %p91_p1  ;;  %s869_s17 = scalar_lea.hbm %s1027_s1, 8704 }
   0x5   : > { %p870_p6 = scmp.ne.s32.totalorder %s1027_s1, %s869_s17  ;;  %p876_p10 = scmp.lt.u32.totalorder %s869_s17, %s1027_s1 }
   0x6   : > { %s1031_s13 = scalar_select %p940_p2, 1, 0 }
   0x7   : > { %p843_p4 = pneg %p940_p2 }
   0x9   : > { %p949_p5 = pnand %p1029_p3, %p843_p4 }
   0xb   : > { %p871_p7 = pneg %p949_p5 }
   0xd   : > { %p872_p8 = pnand %p871_p7, %p870_p6 }
   0xf   : > { %p873_p9 = pneg %p872_p8 }
  0x11   : > { %p878_p11 = pnand %p876_p10, %p873_p9 }
  0x13   : > { %881 = shalt.err (!%p878_p11)
}
  0x14   : > { %s882_s22 = scalar_lea.vmem %s104_s12, 8704  ;;  %p890_p1 = scmp.lt.s32.totalorder %s104_s12, %s104_s12 }
  0x15   : > { %p883_p12 = scmp.ne.s32.totalorder %s104_s12, %s882_s22  ;;  %p891_p4 = scmp.lt.s32.totalorder %s882_s22, %s882_s22 }
  0x17   : > { %p885_p13 = pnand %p883_p12, %p871_p7  ;;  %p892_p3 = por %p891_p4, %p890_p1 }
  0x19   : > { %p886_p0 = pneg %p885_p13 }
  0x1b   : > { %p893_p2 = pnand %p892_p3, %p886_p0 }
  0x1d   : > { %896 = shalt.err (!%p893_p2)
}
  0x1e   : > { %s910_s23 = smov 128   ;;  %s911_s24 = smov 8  }
  0x1f   : > { %846 = dma.hbm_to_vmem [thread:$0]  (!%p949_p5), %s1027_s1, 8704, %s104_s12, [#allocation3], %s910_s23, %s910_s23, %s911_s24  }
  0x20   : > { %p1033_p6 = scmp.ne.s32.totalorder %s1031_s13, 0 }
  0x21   : > { %p1034_p8 = scmp.eq.s32.totalorder (!%p1033_p6), %s936_s10, 0 }
  0x22   : > { %126 = sbr.rel (%p1033_p6) target bundleno = 938 (0x3aa), region = 28 }
  0x29   : > { %902 = dma.done.wait (%p1034_p8), [#allocation3], 8704   ;;  %p1035_p7 = pmov %p1034_p8 }
  0x2a   : > { %p146_p2 = scmp.lt.s32.totalorder %s936_s10, 1  ;;  %v912_v0 = vmov 0.0|0.0   ;;  %vm913_vm0 = vmmov 0   ;;  %v914_v1 = vmov 0.0   ;;  %v155_v2 = vld [vmem:[#allocation2] sm:$0xff]  ;;  %v156_v3 = vld [vmem:[#allocation2 + $0x8] sm:$0xff] }
  0x2b   : > { %904 = vsyncadd (%p1035_p7), [#allocation3], 4294958592  ;;  %764 = vmatprep.subr.bf16.mxu0 %v912_v0  ;;  %656 = vmatprep.mubr.msk.f32.mxu0 %vm913_vm0, %v914_v1  ;;  %v765_v4 = vpack.c.bf16 %v156_v3, %v155_v2  ;;  %v238_v5 = vld [vmem:[#allocation2 + $0x88] sm:$0xff]  ;;  %v239_v6 = vld [vmem:[#allocation2 + $0x90] sm:$0xff]  ;;  %vm162_vm1 = vcmask 130048   ;;  %vm515_vm2 = vcmask 31744  }
  0x2c   : > { %s1037_s10 = smov (!%p146_p2, %s936_s10), 1  ;;  %767 = vmatprep.subr.bf16.mxu1 %v912_v0  ;;  %691 = vmatprep.mubr.msk.f32.mxu1 %vm913_vm0, %v914_v1  ;;  %v240_v7 = vld [vmem:[#allocation2 + $0x98] sm:$0xff]  ;;  %v768_v8 = vpack.c.bf16 %v239_v6, %v238_v5  ;;  %v241_v9 = vld [vmem:[#allocation2 + $0xa0] sm:$0xff]  ;;  %v242_v12 = vld [vmem:[#allocation2 + $0xa8] sm:$0xff] }
  0x2d   : > { %s589_s27 = sshll.u32 %s1037_s10, 3  ;;  %766 = vmatpush3.bf16.msra.mxu0 %v765_v4  ;;  %v771_v11 = vpack.c.bf16 %v241_v9, %v240_v7  ;;  %v243_v13 = vld [vmem:[#allocation2 + $0xb0] sm:$0xff]  ;;  %v244_v15 = vld [vmem:[#allocation2 + $0xb8] sm:$0xff]  ;;  %v245_v16 = vld [vmem:[#allocation2 + $0xc0] sm:$0xff] }
  0x2e   : > { %s149_s30 = scalar_lea.vmem %s1026_s0, %s589_s27  ;;  %769 = vmatpush3.bf16.msra.mxu1 %v768_v8  ;;  %791 = vmatprep.subr.bf16.mxu0 %v912_v0  ;;  %v774_v14 = vpack.c.bf16 %v243_v13, %v242_v12  ;;  %v777_v17 = vpack.c.bf16 %v245_v16, %v244_v15  ;;  %v246_v18 = vld [vmem:[#allocation2 + $0xc8] sm:$0xff]  ;;  %v247_v19 = vld [vmem:[#allocation2 + $0xd0] sm:$0xff]  ;;  %v248_v21 = vld [vmem:[#allocation2 + $0xd8] sm:$0xff]  ;;  %s153_s5 = scalar_lea.vmem %s1028_s2, %s589_s27 }
  0x2f   : > { %v154_v10 = vld [vmem:[%s149_s30] sm:$0xff]  ;;  %770 = vmatprep.subr.bf16.mxu1 %v912_v0  ;;  %v780_v20 = vpack.c.bf16 %v247_v19, %v246_v18  ;;  %v250_v24 = vld [vmem:[#allocation2 + $0xe8] sm:$0xff]  ;;  %v251_v25 = vld [vmem:[#allocation2 + $0xf0] sm:$0xff] }
  0x30   : > { %657 = vmatmul.mubr.msk.f32.vlgmr.msra.gmra.mrb[0].mxu0 %vm162_vm1, %v154_v10  ;;  %v249_v22 = vld [vmem:[#allocation2 + $0xe0] sm:$0xff]  ;;  %v786_v26 = vpack.c.bf16 %v251_v25, %v250_v24  ;;  %v252_v27 = vld [vmem:[#allocation2 + $0xf8] sm:$0xff]  ;;  %v331_v30 = vld [vmem:[#allocation2 + $0x110] sm:$0xff] }
  0x31   : > { %726 = vmatprep.mubr.msk.f32.mxu0 %vm913_vm0, %v914_v1  ;;  %v783_v23 = vpack.c.bf16 %v249_v22, %v248_v21  ;;  %v253_v28 = vld [vmem:[#allocation2 + $0x100] sm:$0xff]  ;;  %v332_v31 = vld [vmem:[#allocation2 + $0x118] sm:$0xff]  ;;  %v334_v34 = vld [vmem:[#allocation2 + $0x128] sm:$0xff] }
  0x32   : > { %772 = vmatpush3.bf16.msra.mxu1 %v771_v11  ;;  %v789_v29 = vpack.c.bf16 %v253_v28, %v252_v27  ;;  %v333_v32 = vld [vmem:[#allocation2 + $0x120] sm:$0xff]  ;;  %v792_v33 = vpack.c.bf16 %v332_v31, %v331_v30  ;;  %v335_v36 = vld [vmem:[#allocation2 + $0x130] sm:$0xff]  ;;  %v336_v37 = vld [vmem:[#allocation2 + $0x138] sm:$0xff] }
  0x33   : > { %773 = vmatprep.subr.bf16.mxu1 %v912_v0  ;;  %v795_v35 = vpack.c.bf16 %v334_v34, %v333_v32  ;;  %v798_v38 = vpack.c.bf16 %v336_v37, %v335_v36  ;;  %v337_v39 = vld [vmem:[#allocation2 + $0x140] sm:$0xff]  ;;  %v338_v40 = vld [vmem:[#allocation2 + $0x148] sm:$0xff]  ;;  %v339_v42 = vld [vmem:[#allocation2 + $0x150] sm:$0xff] }
  0x34   : > { %793 = vmatpush3.bf16.msra.mxu0 %v792_v33  ;;  %v801_v41 = vpack.c.bf16 %v338_v40, %v337_v39  ;;  %v340_v43 = vld [vmem:[#allocation2 + $0x158] sm:$0xff]  ;;  %v591_v45 = vld [vmem:[#allocation2 + $0x80] ss:$0 sm:$0xff]  ;;  %v342_v51 = vld [vmem:[#allocation2 + $0x168] sm:$0xff] }
  0x35   : > { %794 = vmatprep.subr.bf16.mxu0 %v912_v0  ;;  %v804_v44 = vpack.c.bf16 %v340_v43, %v339_v42  ;;  %v341_v50 = vld [vmem:[#allocation2 + $0x160] sm:$0xff]  ;;  %v343_v53 = vld [vmem:[#allocation2 + $0x170] sm:$0xff]  ;;  %v344_v54 = vld [vmem:[#allocation2 + $0x178] sm:$0xff] }
  0x36   : > { %775 = vmatpush3.bf16.msra.mxu1 %v774_v14  ;;  %v807_v52 = vpack.c.bf16 %v342_v51, %v341_v50  ;;  %v810_v55 = vpack.c.bf16 %v344_v54, %v343_v53  ;;  %v345_v56 = vld [vmem:[#allocation2 + $0x180] sm:$0xff]  ;;  %v346_v57 = vld [vmem:[#allocation2 + $0x188] sm:$0xff]  ;;  %v424_v59 = vld [vmem:[#allocation2 + $0x198] sm:$0xff] }
  0x37   : > { %776 = vmatprep.subr.bf16.mxu1 %v912_v0  ;;  %v813_v58 = vpack.c.bf16 %v346_v57, %v345_v56  ;;  %v425_v60 = vld [vmem:[#allocation2 + $0x1a0] sm:$0xff]  ;;  %v426_v61 = vld [vmem:[#allocation2 + $0x1a8] sm:$0xff]  ;;  %v427_v63 = vld [vmem:[#allocation2 + $0x1b0] sm:$0xff] }
  0x38   : > { %796 = vmatpush3.bf16.msra.mxu0 %v795_v35  ;;  %v816_v62 = vpack.c.bf16 %v425_v60, %v424_v59  ;;  %v428_v2 = vld [vmem:[#allocation2 + $0x1b8] sm:$0xff]  ;;  %v429_v3 = vld [vmem:[#allocation2 + $0x1c0] sm:$0xff]  ;;  %v430_v5 = vld [vmem:[#allocation2 + $0x1c8] sm:$0xff] }
  0x39   : > { %797 = vmatprep.subr.bf16.mxu0 %v912_v0  ;;  %v822_v4 = vpack.c.bf16 %v429_v3, %v428_v2  ;;  %v431_v6 = vld [vmem:[#allocation2 + $0x1d0] sm:$0xff]  ;;  %v432_v8 = vld [vmem:[#allocation2 + $0x1d8] sm:$0xff]  ;;  %v433_v9 = vld [vmem:[#allocation2 + $0x1e0] sm:$0xff] }
  0x3a   : > { %778 = vmatpush3.bf16.msra.mxu1 %v777_v17  ;;  %v825_v7 = vpack.c.bf16 %v431_v6, %v430_v5  ;;  %v828_v10 = vpack.c.bf16 %v433_v9, %v432_v8  ;;  %v593_v11 = vld [vmem:[#allocation2 + $0x108] ss:$0 sm:$0xff]  ;;  %v435_v17 = vld [vmem:[#allocation2 + $0x1f0] sm:$0xff]  ;;  %v436_v19 = vld [vmem:[#allocation2 + $0x1f8] sm:$0xff] }
  0x3b   : > { %779 = vmatprep.subr.bf16.mxu1 %v912_v0  ;;  %v434_v16 = vld [vmem:[#allocation2 + $0x1e8] sm:$0xff]  ;;  %v594_v25 = vld [vmem:[#allocation2 + $0x190] ss:$0 sm:$0xff]  ;;  %v595_v30 = vld [vmem:[#allocation2 + $0x218] ss:$0 sm:$0xff] }
  0x3c   : > { %799 = vmatpush3.bf16.msra.mxu0 %v798_v38  ;;  %v831_v18 = vpack.c.bf16 %v435_v17, %v434_v16  ;;  %v438_v22 = vld [vmem:[#allocation2 + $0x208] sm:$0xff] }
  0x3d   : > { %800 = vmatprep.subr.bf16.mxu0 %v912_v0 }
  0x3e   : > { %781 = vmatpush3.bf16.msra.mxu1 %v780_v20  ;;  %v437_v20 = vld [vmem:[#allocation2 + $0x200] sm:$0xff] }
  0x3f   : > { %782 = vmatprep.subr.bf16.mxu1 %v912_v0  ;;  %v834_v21 = vpack.c.bf16 %v437_v20, %v436_v19 }
  0x40   : > { %802 = vmatpush3.bf16.msra.mxu0 %v801_v41 }
  0x41   : > { %803 = vmatprep.subr.bf16.mxu0 %v912_v0 }
  0x42   : > { %784 = vmatpush3.bf16.msra.mxu1 %v783_v23  ;;  %v439_v23 = vld [vmem:[#allocation2 + $0x210] sm:$0xff] }
  0x43   : > { %785 = vmatprep.subr.bf16.mxu1 %v912_v0  ;;  %v837_v24 = vpack.c.bf16 %v439_v23, %v438_v22 }
  0x44   : > { %805 = vmatpush3.bf16.msra.mxu0 %v804_v44 }
  0x45   : > { %806 = vmatprep.subr.bf16.mxu0 %v912_v0 }
  0x46   : > { %787 = vmatpush3.bf16.msra.mxu1 %v786_v26 }
  0x47   : > { %788 = vmatprep.subr.bf16.mxu1 %v912_v0 }
  0x48   : > { %808 = vmatpush3.bf16.msra.mxu0 %v807_v52 }
  0x49   : > { %809 = vmatprep.subr.bf16.mxu0 %v912_v0 }
  0x4a   : > { %790 = vmatpush3.bf16.msra.mxu1 %v789_v29 }
  0x4b   : > { %815 = vmatprep.subr.bf16.mxu1 %v912_v0 }
  0x4c   : > { %811 = vmatpush3.bf16.msra.mxu0 %v810_v55 }
  0x4d   : > { %812 = vmatprep.subr.bf16.mxu0 %v912_v0 }
  0x50   : > { %814 = vmatpush3.bf16.msra.mxu0 %v813_v58 }
 0x103   : > { %v232_v46 = vpop.f32.mrb[0].mxu0 }
 0x104   : > { %v233_v47 = vadd.f32 %v591_v45, %v232_v46  ;;  %v658_v48 = vpop.f32.mrb[1].mxu0 }
 0x106   : > { %863 = vtanh.f32 %v233_v47 }
 0x110   : > { %v864_v49 = vpop.eup %863 }
 0x111   : > { %692 = vmatmul.mubr.f32.vlgmr.msra.gmra.mrb[0].mxu1 %v864_v49 }
 0x112   : > { %761 = vmatprep.mubr.msk.f32.mxu1 %vm913_vm0, %v914_v1  ;;  %817 = vmatpush3.bf16.msra.mxu1 %v816_v62  ;;  %v819_v1 = vpack.c.bf16 %v427_v63, %v426_v61 }
 0x113   : > { %818 = vmatprep.subr.bf16.mxu1 %v912_v0 }
 0x116   : > { %820 = vmatpush3.bf16.msra.mxu1 %v819_v1 }
 0x117   : > { %821 = vmatprep.subr.bf16.mxu1 %v912_v0 }
 0x11a   : > { %823 = vmatpush3.bf16.msra.mxu1 %v822_v4 }
 0x11b   : > { %824 = vmatprep.subr.bf16.mxu1 %v912_v0 }
 0x11e   : > { %826 = vmatpush3.bf16.msra.mxu1 %v825_v7 }
 0x11f   : > { %827 = vmatprep.subr.bf16.mxu1 %v912_v0 }
 0x122   : > { %829 = vmatpush3.bf16.msra.mxu1 %v828_v10 }
 0x123   : > { %830 = vmatprep.subr.bf16.mxu1 %v912_v0 }
 0x126   : > { %832 = vmatpush3.bf16.msra.mxu1 %v831_v18 }
 0x127   : > { %833 = vmatprep.subr.bf16.mxu1 %v912_v0 }
 0x12a   : > { %835 = vmatpush3.bf16.msra.mxu1 %v834_v21 }
 0x12b   : > { %836 = vmatprep.subr.bf16.mxu1 %v912_v0 }
 0x12e   : > { %838 = vmatpush3.bf16.msra.mxu1 %v837_v24 }
 0x1e4   : > { %v325_v12 = vpop.f32.mrb[0].mxu1 }
 0x1e5   : > { %v326_v13 = vadd.f32 %v593_v11, %v325_v12  ;;  %v693_v14 = vpop.f32.mrb[1].mxu1 }
 0x1e7   : > { %865 = vtanh.f32 %v326_v13 }
 0x1f1   : > { %v866_v15 = vpop.eup %865 }
 0x1f2   : > { %727 = vmatmul.mubr.f32.vlgmr.msra.gmra.mrb[2].mxu0 %v866_v15 }
 0x2c5   : > { %v418_v26 = vpop.f32.mrb[2].mxu0 }
 0x2c6   : > { %v419_v27 = vadd.f32 %v594_v25, %v418_v26  ;;  %v728_v28 = vpop.f32.mrb[3].mxu0 }
 0x2c8   : > { %867 = vtanh.f32 %v419_v27 }
 0x2d2   : > { %v868_v29 = vpop.eup %867 }
 0x2d3   : > { %762 = vmatmul.mubr.f32.vlgmr.msra.gmra.mrb[2].mxu1 %v868_v29 }
 0x3a6   : > { %v511_v31 = vpop.f32.mrb[2].mxu1 }
 0x3a7   : > { %v512_v32 = vadd.f32 %v595_v30, %v511_v31  ;;  %v763_v33 = vpop.f32.mrb[3].mxu1 }
 0x3a9   : > { %516 = vst.msk [vmem:[%s153_s5] sm:$0xff] %vm515_vm2, %v512_v32 }
 0x3aa PF: > { %s13_s9 = sadd.s32 1, %s907_s9  }
 0x3ab   : > { %p10_p3 = scmp.ge.s32.totalorder %s13_s9, 4  }
 0x3ad   :  { %12 = sbr.rel (!%p10_p3) target bundleno = 1 (0x1), region = 66 }
 0x3b4   :  { %536 = vsyncpa [#allocation3], 1 }
 0x3b5   :  { %538 = vsyncpa [#allocation3 + $0x1], 1 }

</bundles_post_ra>
